<compile_context>
chip_gen: v7x
topology: tpu7x:2x2x1
jax: 0.10.0
libtpu: 0.0.40
codegen_flags: <defaults>
</compile_context>

<pallas_src>
import math
import jax
import jax.numpy as jnp
from jax.experimental import pallas as pl
from jax.experimental.pallas import tpu as pltpu


def _round_up(x: int, m: int) -> int:
    return ((x + m - 1) // m) * m


def _sublane(dtype) -> int:
    """Minimum sublane multiple for a dtype (sub-32-bit packs along sublanes)."""
    itemsize = jnp.dtype(dtype).itemsize
    return max(8, 32 // itemsize)          # 8 for f32, 16 for bf16, 32 for int8/fp8


def _balanced_tile(dim: int, tile_max: int, align: int) -> int:
    """Largest tile <= tile_max that balances work across blocks (min padding)."""
    n_blocks = max(1, pl.cdiv(dim, tile_max))
    t = _round_up(pl.cdiv(dim, n_blocks), align)
    return min(t, _round_up(dim, align))


def _linear_kernel_accum_out(a_ref, w_ref, b_ref, o_ref):
    """f32 output: accumulate directly into the output-resident tile."""
    k = pl.program_id(2)

    @pl.when(k == 0)
    def _init():
        # Bias is the initial value of the accumulator (f32).
        o_ref[...] = jnp.broadcast_to(b_ref[...], o_ref.shape).astype(o_ref.dtype)

    o_ref[...] += jnp.dot(
        a_ref[...], w_ref[...], preferred_element_type=jnp.float32
    )


def _linear_kernel_scratch(a_ref, w_ref, b_ref, o_ref, acc_ref):
    """Low-precision output: f32 VMEM accumulator, downcast on the last k step."""
    k = pl.program_id(2)

    @pl.when(k == 0)
    def _init():
        acc_ref[...] = jnp.broadcast_to(b_ref[...], acc_ref.shape).astype(jnp.float32)

    acc_ref[...] += jnp.dot(
        a_ref[...], w_ref[...], preferred_element_type=jnp.float32
    )

    @pl.when(k == pl.num_programs(2) - 1)
    def _finalize():
        o_ref[...] = acc_ref[...].astype(o_ref.dtype)


def linear_forward(A, w, b, *, tm=512, tn=1024, tk=512, compute_dtype=None):
    """y = A @ w + b via a tiled Pallas matmul kernel.

    compute_dtype: optional operand dtype (e.g. jnp.bfloat16) for the MXU fast
    path; accumulation stays f32 and the bias is added in f32.
    """
    M, K = A.shape
    Kw, N = w.shape
    if K != Kw:
        raise RuntimeError(
            f"Shape mismatch: Input shape {A.shape} can't broadcast with the weights {w.shape}"
        )

    out_dtype = jnp.result_type(A.dtype, w.dtype)

    # Optional low-precision operand path (f32 accumulation is preserved).
    if compute_dtype is not None:
        A_c = A.astype(compute_dtype)
        w_c = w.astype(compute_dtype)
    else:
        A_c, w_c = A, w
    b_c = b.astype(jnp.float32)  # bias always added in f32

    lane = 128
    sub = _sublane(A_c.dtype)

    # Balanced, dtype-aware tile sizes.
    tm = _balanced_tile(M, tm, sub)
    tn = _balanced_tile(N, tn, lane)
    tk = _balanced_tile(K, tk, lane)

    # v7x has 2 TensorCores: if the M "parallel" axis has a single block, give
    # the N axis at least 2 blocks so both cores get work.
    if pl.cdiv(M, tm) == 1 and pl.cdiv(N, tn) == 1 and N > lane:
        tn = _balanced_tile(N, max(lane, _round_up(pl.cdiv(N, 2), lane)), lane)

    M_pad = _round_up(M, tm)
    N_pad = _round_up(N, tn)
    K_pad = _round_up(K, tk)

    # Zero-pad to tile multiples (K padding is exact for the reduction; padded
    # M/N rows/cols are sliced off).  In a real model, cache the padded weight
    # outside the hot path instead of re-padding every call.
    A_p = A_c
    if (M_pad, K_pad) != (M, K):
        A_p = jnp.pad(A_c, ((0, M_pad - M), (0, K_pad - K)))
    w_p = w_c
    if (K_pad, N_pad) != (K, N):
        w_p = jnp.pad(w_c, ((0, K_pad - K), (0, N_pad - N)))
    b_p = b_c
    if N_pad != N:
        b_p = jnp.pad(b_c, (0, N_pad - N))
    b2 = b_p.reshape(1, N_pad)  # 2-D so the bias tile is lane-major

    m_blocks = M_pad // tm
    n_blocks = N_pad // tn
    k_blocks = K_pad // tk
    grid = (m_blocks, n_blocks, k_blocks)

    use_scratch = jnp.dtype(out_dtype) != jnp.float32
    if use_scratch:
        kernel = _linear_kernel_scratch
        scratch_shapes = [pltpu.VMEM((tm, tn), jnp.float32)]
    else:
        kernel = _linear_kernel_accum_out
        scratch_shapes = []

    # VMEM budget: double-buffered inputs + output tile (+ optional scratch).
    it_a = A_p.dtype.itemsize
    it_w = w_p.dtype.itemsize
    it_o = jnp.dtype(out_dtype).itemsize
    vmem_bytes = (
        2 * (tm * tk * it_a + tk * tn * it_w + tn * 4)
        + 2 * tm * tn * it_o
        + (tm * tn * 4 if use_scratch else 0)
    )
    vmem_limit = int(vmem_bytes * 1.5) + (2 << 20)

    # Advisory cost: A is re-streamed once per N block, W once per M block.
    cost = pl.CostEstimate(
        flops=2 * M_pad * N_pad * K_pad,
        transcendentals=0,
        bytes_accessed=(
            A_p.size * it_a * n_blocks
            + w_p.size * it_w * m_blocks
            + b2.size * b2.dtype.itemsize * m_blocks
            + M_pad * N_pad * it_o
        ),
    )

    y_pad = pl.pallas_call(
        kernel,
        out_shape=jax.ShapeDtypeStruct((M_pad, N_pad), out_dtype),
        grid_spec=pltpu.PrefetchScalarGridSpec(
            num_scalar_prefetch=0,
            grid=grid,
            in_specs=[
                pl.BlockSpec((tm, tk), lambda i, j, k: (i, k)),  # A tile
                pl.BlockSpec((tk, tn), lambda i, j, k: (k, j)),  # W tile (streamed over K)
                pl.BlockSpec((1, tn), lambda i, j, k: (0, j)),   # bias tile
            ],
            out_specs=pl.BlockSpec((tm, tn), lambda i, j, k: (i, j)),
            scratch_shapes=scratch_shapes,
        ),
        compiler_params=pltpu.CompilerParams(
            dimension_semantics=("parallel", "parallel", "arbitrary"),
            vmem_limit_bytes=vmem_limit,
        ),
        cost_estimate=cost,
    )(A_p, w_p, b2)

    if (M_pad, N_pad) != (M, N):
        y_pad = y_pad[:M, :N]
    return y_pad


def init_linear_params(key, in_features, out_features, dtype=jnp.float32):
    # kaiming_normal_(mode='fan_in', nonlinearity='relu'): std = sqrt(2 / fan_in)
    std = math.sqrt(2.0 / in_features)
    w = jax.random.normal(key, (in_features, out_features), dtype=dtype) * std
    b = jnp.zeros((out_features,), dtype=dtype)
    return w, b


if __name__ == "__main__":
    key = jax.random.PRNGKey(0)
    k_w, k_a, k_w2, k_a2, k_w3, k_a3 = jax.random.split(key, 6)

    # Case 1: small tile-aligned shapes (f32 path, accumulate-into-output kernel).
    batch, in_features, out_features = 8, 32, 128
    w, b = init_linear_params(k_w, in_features, out_features)
    A = jax.random.normal(k_a, (batch, in_features), dtype=jnp.float32)
    y = jax.block_until_ready(linear_forward(A, w, b))
    y_ref = A @ w + b
    assert y.shape == (batch, out_features)
    assert jnp.allclose(y, y_ref, atol=1e-5, rtol=1e-5)

    # Case 2: non-multiple shapes — exercises balanced tiles, pad/tail path,
    # and the dual-TC N-axis split (grid has 2 blocks along N).
    batch2, in2, out2 = 10, 33, 130
    w2, b2 = init_linear_params(k_w2, in2, out2)
    A2 = jax.random.normal(k_a2, (batch2, in2), dtype=jnp.float32)
    y2 = jax.block_until_ready(linear_forward(A2, w2, b2))
    y2_ref = A2 @ w2 + b2
    assert y2.shape == (batch2, out2)
    assert jnp.allclose(y2, y2_ref, atol=1e-5, rtol=1e-5)

    # Case 3: bf16 operand fast path (MXU-native on v6e/v7x); f32 accumulation,
    # f32 bias, f32 output.  Looser tolerance vs. the f32 reference is expected.
    batch3, in3, out3 = 64, 256, 256
    w3, b3 = init_linear_params(k_w3, in3, out3)
    A3 = jax.random.normal(k_a3, (batch3, in3), dtype=jnp.float32)
    y3 = jax.block_until_ready(
        linear_forward(A3, w3, b3, compute_dtype=jnp.bfloat16)
    )
    y3_ref = A3 @ w3 + b3
    assert y3.shape == (batch3, out3)
    assert jnp.allclose(y3, y3_ref, atol=1e-1, rtol=5e-2)

    print("KERNEL_OK")
</pallas_src>

<mosaic_0001>
module attributes {stable_mosaic.version = 11 : i64} {
  func.func @_linear_kernel_accum_out(%arg0: i32, %arg1: i32, %arg2: i32, %arg3: memref<8x128xf32, #tpu.memory_space<vmem>>, %arg4: memref<128x128xf32, #tpu.memory_space<vmem>>, %arg5: memref<1x128xf32, #tpu.memory_space<vmem>>, %arg6: memref<8x128xf32, #tpu.memory_space<vmem>>) attributes {dimension_semantics = [#tpu.dimension_semantics<parallel>, #tpu.dimension_semantics<parallel>, #tpu.dimension_semantics<arbitrary>], iteration_bounds = array<i64: 1, 1, 1>, scalar_prefetch = 0 : i64, scratch_operands = 0 : i64, tpu.core_type = #tpu.core_type<tc>, window_params = [{transform_indices = @transform_0, window_bounds = array<i64: 8, 128>}, {transform_indices = @transform_1, window_bounds = array<i64: 128, 128>}, {transform_indices = @transform_2, window_bounds = array<i64: 1, 128>}, {transform_indices = @transform_3, window_bounds = array<i64: 8, 128>}]} {
    %c0_i32 = arith.constant 0 : i32
    %0 = arith.cmpi eq, %arg2, %c0_i32 : i32
    %1 = arith.extui %0 : i1 to i32
    %c0_i32_0 = arith.constant 0 : i32
    %2 = arith.cmpi ne, %1, %c0_i32_0 : i32
    scf.if %2 {
      %c0_8 = arith.constant 0 : index
      %c0_9 = arith.constant 0 : index
      %9 = vector.load %arg5[%c0_8, %c0_9] : memref<1x128xf32, #tpu.memory_space<vmem>>, vector<1x128xf32>
      %10 = vector.shape_cast %9 : vector<1x128xf32> to vector<1x128xf32>
      %11 = vector.broadcast %10 : vector<1x128xf32> to vector<8x128xf32>
      %c0_10 = arith.constant 0 : index
      %c0_11 = arith.constant 0 : index
      %12 = vector.load %arg6[%c0_10, %c0_11] : memref<8x128xf32, #tpu.memory_space<vmem>>, vector<8x128xf32>
      tpu.vector_store %arg6[%c0_10, %c0_11], %11 {strides = array<i32>} : memref<8x128xf32, #tpu.memory_space<vmem>>, vector<8x128xf32>,
    } else {
    }
    %c0 = arith.constant 0 : index
    %c0_1 = arith.constant 0 : index
    %3 = vector.load %arg6[%c0, %c0_1] : memref<8x128xf32, #tpu.memory_space<vmem>>, vector<8x128xf32>
    %c0_2 = arith.constant 0 : index
    %c0_3 = arith.constant 0 : index
    %4 = vector.load %arg3[%c0_2, %c0_3] : memref<8x128xf32, #tpu.memory_space<vmem>>, vector<8x128xf32>
    %c0_4 = arith.constant 0 : index
    %c0_5 = arith.constant 0 : index
    %5 = vector.load %arg4[%c0_4, %c0_5] : memref<128x128xf32, #tpu.memory_space<vmem>>, vector<128x128xf32>
    %cst = arith.constant dense<0.000000e+00> : vector<8x128xf32>
    %6 = tpu.matmul %4, %5, %cst {dimension_numbers = #tpu.dot_dimension_numbers<[1], [0], [0], [1], [0, 0, 1, 1], [], []>} : vector<8x128xf32>, vector<128x128xf32>, vector<8x128xf32> -> vector<8x128xf32>
    %7 = arith.addf %3, %6 : vector<8x128xf32>
    %c0_6 = arith.constant 0 : index
    %c0_7 = arith.constant 0 : index
    %8 = vector.load %arg6[%c0_6, %c0_7] : memref<8x128xf32, #tpu.memory_space<vmem>>, vector<8x128xf32>
    tpu.vector_store %arg6[%c0_6, %c0_7], %7 {strides = array<i32>} : memref<8x128xf32, #tpu.memory_space<vmem>>, vector<8x128xf32>,
    return
  }
  func.func @transform_0(%arg0: i32, %arg1: i32, %arg2: i32) -> (i32, i32) {
    %c0_i32 = arith.constant 0 : i32
    return %arg0, %arg2 : i32, i32
  }
  func.func @transform_1(%arg0: i32, %arg1: i32, %arg2: i32) -> (i32, i32) {
    %c0_i32 = arith.constant 0 : i32
    return %arg2, %arg1 : i32, i32
  }
  func.func @transform_2(%arg0: i32, %arg1: i32, %arg2: i32) -> (i32, i32) {
    %c0_i32 = arith.constant 0 : i32
    %c0_i32_0 = arith.constant 0 : i32
    return %c0_i32, %arg1 : i32, i32
  }
  func.func @transform_3(%arg0: i32, %arg1: i32, %arg2: i32) -> (i32, i32) {
    %c0_i32 = arith.constant 0 : i32
    return %arg0, %arg1 : i32, i32
  }
}

</mosaic_0001>

<bundles_post_ra>
// kernel: tpu_custom_call.1
= control target key start
LH: loop header
LB: loop body
LE: loop exit
PB: predicated region body
PF: predicated region fallthrough
CT: control target
= control target key end

     0   :  { %8 = vsyncpa [#allocation3], 0  ;;  %s390_s0 = inlined_call_operand.hbm [shape: f32[8,128], index: 0, kind: input, shape index: {}]   ;;  %s391_s1 = inlined_call_operand.hbm [shape: f32[128,128], index: 1, kind: input, shape index: {}]   ;;  %s392_s2 = inlined_call_operand.vmem [shape: f32[1,128], index: 2, kind: input, shape index: {}]   ;;  %s393_s3 = inlined_call_operand.hbm [shape: f32[8,128], index: 3, kind: output, shape index: {}]  }
   0x1   :  { %9 = vsyncpa [#allocation6], 0 }
   0x2   :  { %10 = vsyncpa [#allocation4], 0  ;;  %s316_s12 = smov [#allocation2]   ;;  %s317_s14 = smov [#allocation5]  }
   0x3   :  { %s17_s13 = sshll.u32 %s316_s12, 4  ;;  %s26_s15 = sshll.u32 %s317_s14, 4  ;;  %s18_s13 = int_to_ptr.vmem [resolvable:$true] %s17_s13  ;;  %s344_s15 = int_to_ptr.vmem [resolvable:$true] %s26_s15 }
   0x4   :  { %s244_s18 = scalar_lea.hbm %s390_s0, 128 }
   0x5   :  { %p245_p0 = scmp.ne.s32.totalorder %s390_s0, %s244_s18  ;;  %p248_p1 = scmp.lt.u32.totalorder %s244_s18, %s390_s0 }
   0x7   :  { %p250_p2 = pnand %p248_p1, %p245_p0 }
   0x9   :  { %253 = shalt.err (!%p250_p2)
}
   0xa   :  { %s254_s23 = scalar_lea.vmem %s18_s13, 128  ;;  %p259_p4 = scmp.lt.s32.totalorder %s18_s13, %s18_s13 }
   0xb   :  { %p255_p3 = scmp.ne.s32.totalorder %s18_s13, %s254_s23  ;;  %p260_p5 = scmp.lt.s32.totalorder %s254_s23, %s254_s23 }
   0xd   :  { %p261_p6 = por %p260_p5, %p259_p4 }
   0xf   :  { %p262_p7 = pnand %p261_p6, %p255_p3 }
  0x11   :  { %265 = shalt.err (!%p262_p7)
}
  0x12   :  { %20 = dma.hbm_to_vmem [thread:$0]  %s390_s0, 128, %s18_s13, [#allocation3]  }
  0x13   :  { %s266_s28 = scalar_lea.hbm %s391_s1, 2048 }
  0x14   :  { %p267_p8 = scmp.ne.s32.totalorder %s391_s1, %s266_s28  ;;  %p270_p9 = scmp.lt.u32.totalorder %s266_s28, %s391_s1 }
  0x16   :  { %p272_p10 = pnand %p270_p9, %p267_p8 }
  0x18   :  { %275 = shalt.err (!%p272_p10)
}
  0x19   :  { %s276_s6 = scalar_lea.vmem %s344_s15, 2048  ;;  %p281_p12 = scmp.lt.s32.totalorder %s344_s15, %s344_s15 }
  0x1a   :  { %p277_p11 = scmp.ne.s32.totalorder %s344_s15, %s276_s6  ;;  %p282_p13 = scmp.lt.s32.totalorder %s276_s6, %s276_s6 }
  0x1c   :  { %p283_p0 = por %p282_p13, %p281_p12 }
  0x1e   :  { %p284_p1 = pnand %p283_p0, %p277_p11 }
  0x20   :  { %287 = shalt.err (!%p284_p1)
}
  0x21   :  { %s318_s0 = smov 128   ;;  %s319_s7 = smov 8  }
  0x22   :  { %32 = dma.hbm_to_vmem [thread:$0]  %s391_s1, 2048, %s344_s15, [#allocation6], %s318_s0, %s318_s0, %s319_s7  }
  0x23   :  { %310 = dma.done.wait [#allocation3], 128  }
  0x24   :  { %311 = vsyncadd [#allocation3], 4294967168 }
  0x25   :  { %312 = dma.done.wait [#allocation6], 2048  }
  0x26   :  { %313 = vsyncadd [#allocation6], 4294965248  ;;  %v320_v0 = vmov 0.0|0.0   ;;  %vm321_vm0 = vmmov 0   ;;  %v322_v1 = vmov 0.0   ;;  %v55_v2 = vld [vmem:[#allocation5] sm:$0xff] }
  0x27   :  { %212 = vmatprep.subr.bf16.mxu0 %v320_v0  ;;  %209 = vmatprep.mubr.msk.f32.mxu0 %vm321_vm0, %v322_v1  ;;  %v56_v3 = vld [vmem:[#allocation5 + $0x8] sm:$0xff]  ;;  %v57_v4 = vld [vmem:[#allocation5 + $0x10] sm:$0xff]  ;;  %v58_v6 = vld [vmem:[#allocation5 + $0x18] sm:$0xff]  ;;  %s323_s11 = smov [#allocation7]  }
  0x28   :  { %v213_v5 = vpack.c.bf16 %v56_v3, %v55_v2  ;;  %v216_v7 = vpack.c.bf16 %v58_v6, %v57_v4  ;;  %v59_v8 = vld [vmem:[#allocation5 + $0x20] sm:$0xff]  ;;  %v60_v9 = vld [vmem:[#allocation5 + $0x28] sm:$0xff]  ;;  %v61_v11 = vld [vmem:[#allocation5 + $0x30] sm:$0xff]  ;;  %s149_s12 = sshll.u32 %s323_s11, 4  ;;  %s150_s12 = int_to_ptr.vmem [resolvable:$true] %s149_s12 }
  0x29   :  { %v219_v10 = vpack.c.bf16 %v60_v9, %v59_v8  ;;  %v62_v12 = vld [vmem:[#allocation5 + $0x38] sm:$0xff]  ;;  %v63_v14 = vld [vmem:[#allocation5 + $0x40] sm:$0xff]  ;;  %v64_v15 = vld [vmem:[#allocation5 + $0x48] sm:$0xff]  ;;  %s288_s13 = scalar_lea.vmem %s150_s12, 128  ;;  %p293_p3 = scmp.lt.s32.totalorder %s150_s12, %s150_s12 }
  0x2a   :  { %214 = vmatpush3.bf16.msra.mxu0 %v213_v5  ;;  %v222_v13 = vpack.c.bf16 %v62_v12, %v61_v11  ;;  %v225_v16 = vpack.c.bf16 %v64_v15, %v63_v14  ;;  %v65_v17 = vld [vmem:[#allocation5 + $0x50] sm:$0xff]  ;;  %v66_v18 = vld [vmem:[#allocation5 + $0x58] sm:$0xff]  ;;  %v67_v20 = vld [vmem:[#allocation5 + $0x60] sm:$0xff]  ;;  %p289_p2 = scmp.ne.s32.totalorder %s150_s12, %s288_s13  ;;  %p294_p4 = scmp.lt.s32.totalorder %s288_s13, %s288_s13 }
  0x2b   :  { %215 = vmatprep.subr.bf16.mxu0 %v320_v0  ;;  %v228_v19 = vpack.c.bf16 %v66_v18, %v65_v17  ;;  %v68_v21 = vld [vmem:[#allocation5 + $0x68] sm:$0xff]  ;;  %v69_v23 = vld [vmem:[#allocation5 + $0x70] sm:$0xff]  ;;  %v70_v24 = vld [vmem:[#allocation5 + $0x78] sm:$0xff] }
  0x2c   :  { %v231_v22 = vpack.c.bf16 %v68_v21, %v67_v20  ;;  %v234_v25 = vpack.c.bf16 %v70_v24, %v69_v23  ;;  %v54_v26 = vld [vmem:[#allocation2] sm:$0xff]  ;;  %p295_p5 = por %p294_p4, %p293_p3 }
  0x2d   :  { %v159_v27 = vld [vmem:[%s392_s2] ss:$0 sm:$0xff] }
  0x2e   :  { %217 = vmatpush3.bf16.msra.mxu0 %v216_v7  ;;  %p296_p6 = pnand %p295_p5, %p289_p2 }
  0x2f   :  { %218 = vmatprep.subr.bf16.mxu0 %v320_v0 }
  0x32   :  { %220 = vmatpush3.bf16.msra.mxu0 %v219_v10 }
  0x33   :  { %221 = vmatprep.subr.bf16.mxu0 %v320_v0 }
  0x36   :  { %223 = vmatpush3.bf16.msra.mxu0 %v222_v13 }
  0x37   :  { %224 = vmatprep.subr.bf16.mxu0 %v320_v0 }
  0x3a   :  { %226 = vmatpush3.bf16.msra.mxu0 %v225_v16 }
  0x3b   :  { %227 = vmatprep.subr.bf16.mxu0 %v320_v0 }
  0x3e   :  { %229 = vmatpush3.bf16.msra.mxu0 %v228_v19 }
  0x3f   :  { %230 = vmatprep.subr.bf16.mxu0 %v320_v0 }
  0x42   :  { %232 = vmatpush3.bf16.msra.mxu0 %v231_v22 }
  0x43   :  { %233 = vmatprep.subr.bf16.mxu0 %v320_v0 }
  0x46   :  { %235 = vmatpush3.bf16.msra.mxu0 %v234_v25 }
  0x49   :  { %210 = vmatmul.mubr.f32.vlgmr.msra.gmra.mrb[0].mxu0 %v54_v26 }
 0x11c   :  { %v137_v28 = vpop.f32.mrb[0].mxu0 }
 0x11d   :  { %v141_v29 = vadd.f32 %v159_v27, %v137_v28  ;;  %v211_v30 = vpop.f32.mrb[1].mxu0 }
 0x11f   :  { %142 = vst [vmem:[#allocation7] sm:$0xff] %v141_v29 }
 0x120   :  { %299 = shalt.err (!%p296_p6)
}
 0x121   :  { %s300_s16 = scalar_lea.hbm %s393_s3, 128 }
 0x122   :  { %p301_p7 = scmp.ne.s32.totalorder %s393_s3, %s300_s16  ;;  %p304_p8 = scmp.lt.u32.totalorder %s300_s16, %s393_s3 }
 0x124   :  { %p306_p9 = pnand %p304_p8, %p301_p7 }
 0x126   :  { %309 = shalt.err (!%p306_p9)
}
 0x127   :  { %152 = dma.vmem_to_hbm [thread:$0]  %s150_s12, 128, %s393_s3, [#allocation4]  }
 0x128   :  { %314 = dma.done.wait [#allocation4], 128  }
 0x129   :  { %315 = vsyncadd [#allocation4], 4294967168 }
 0x12a   :  { %156 = vsyncpa [#allocation3], 1 }
 0x12b   :  { %157 = vsyncpa [#allocation6], 1 }
 0x12c   :  { %158 = vsyncpa [#allocation4], 1 }

</bundles_post_ra>
